<compile_context>
chip_gen: v7x
topology: tpu7x:2x2x1
jax: 0.10.0
libtpu: 0.0.40
codegen_flags: <defaults>
</compile_context>

<pallas_src>
import functools

import jax
import jax.numpy as jnp
from jax.experimental import pallas as pl
from jax.experimental.pallas import tpu as pltpu

BN_EPS = 1e-5


def _round_up(x: int, m: int) -> int:
    return (x + m - 1) // m * m


def _cdiv(a: int, b: int) -> int:
    return (a + b - 1) // b


def _vmem_capacity_bytes() -> int:
    try:
        return int(pltpu.get_tpu_info().vmem_capacity_bytes)
    except Exception:
        return 64 << 20          # conservative fallback = v7x per-TC VMEM


# -----------------------------------------------------------------------------
# Kernels
# -----------------------------------------------------------------------------
def _point_block_tile_kernel(z1_ref, x_ref, scale_ref, shift_ref, w_ref, b_ref,
                             o_ref):
    """One (tile_n, tile_f) output tile: folded-BN FMA -> SiLU -> matmul -> +z1."""
    x = x_ref[...].astype(jnp.float32)                    # (tile_n, ni)
    xn = x * scale_ref[...] + shift_ref[...]              # folded BatchNorm affine
    s = xn * jax.nn.sigmoid(xn)                           # SiLU (exp/recip -> EUP)
    y = jnp.dot(s.astype(w_ref.dtype), w_ref[...],
                preferred_element_type=jnp.float32)       # (tile_n, tile_f) on MXU
    y = y + b_ref[...]
    o_ref[...] = (z1_ref[...].astype(jnp.float32) + y).astype(o_ref.dtype)


def _point_block_fused_kernel(z1_ref, x_ref, gamma_ref, beta_ref, w_ref, b_ref,
                              o_ref):
    """Grid-less path for small clouds: BN batch stats computed in-kernel."""
    x = x_ref[...].astype(jnp.float32)                    # (N, ni), fully resident
    mean = jnp.mean(x, axis=0, keepdims=True)
    var = jnp.mean(jnp.square(x - mean), axis=0, keepdims=True)
    scale = gamma_ref[...].astype(jnp.float32) * jax.lax.rsqrt(var + BN_EPS)
    shift = beta_ref[...].astype(jnp.float32) - mean * scale
    xn = x * scale + shift
    s = xn * jax.nn.sigmoid(xn)
    y = jnp.dot(s.astype(w_ref.dtype), w_ref[...],
                preferred_element_type=jnp.float32)
    y = y + b_ref[...].astype(jnp.float32)
    o_ref[...] = (z1_ref[...].astype(jnp.float32) + y).astype(o_ref.dtype)


# -----------------------------------------------------------------------------
# Wrapper
# -----------------------------------------------------------------------------
@functools.partial(jax.jit,
                   static_argnames=("allow_fused", "max_weight_block_bytes"))
def point_block(z1_f, z_f, gamma, beta, weight, bias, *,
                allow_fused: bool = True,
                max_weight_block_bytes: int = 16 << 20):
    """z1_f: (N, nf), z_f: (N, ni), gamma/beta: (ni,), weight: (nf, ni), bias: (nf,)."""
    n, ni = z_f.shape
    n1, nf = z1_f.shape
    assert n1 == n and weight.shape == (nf, ni) and bias.shape == (nf,)

    w_t = weight.T                                         # (ni, nf)
    # Feed the MXU in bf16 only when the layer is big enough to be compute bound.
    if ni >= 1024 and nf >= 1024 and w_t.dtype == jnp.float32:
        w_t = w_t.astype(jnp.bfloat16)
    gamma2 = gamma.reshape(1, ni).astype(jnp.float32)
    beta2 = beta.reshape(1, ni).astype(jnp.float32)
    bias2 = bias.reshape(1, nf).astype(jnp.float32)

    zb = z1_f.dtype.itemsize
    xb = z_f.dtype.itemsize
    wb = w_t.dtype.itemsize
    ob = zb

    physical = _vmem_capacity_bytes()
    usable = int(physical * 0.7)

    cost = pl.CostEstimate(
        flops=2 * n * ni * nf + 8 * n * ni,
        transcendentals=2 * n * ni,                        # sigmoid ~= exp + recip
        bytes_accessed=(n * (ni * xb + nf * (zb + ob)) + ni * nf * wb
                        + 4 * (2 * ni + nf)),
    )

    # ---- Fused grid-less path: whole problem resident in VMEM, BN stats
    # ---- computed in-kernel -> z.F is read from HBM exactly once.
    fused_need = (n * ni * (xb + 3 * 4)                    # x + f32 temporaries
                  + n * nf * (zb + ob + 4)                 # z1 + out + f32 y
                  + ni * nf * wb + 4 * (2 * ni + nf))
    if allow_fused and fused_need <= min(24 << 20, usable // 2):
        return pl.pallas_call(
            _point_block_fused_kernel,
            out_shape=jax.ShapeDtypeStruct((n, nf), z1_f.dtype),
            compiler_params=pltpu.CompilerParams(
                vmem_limit_bytes=max(16 << 20,
                                     min(usable, fused_need + (8 << 20)))),
            cost_estimate=cost,
        )(z1_f, z_f, gamma2, beta2, w_t, bias2)

    # ---- Tiled path.  BatchNorm batch stats folded into per-channel
    # ---- (scale, shift) in the wrapper (reduction over the unpadded N), so the
    # ---- kernel is a pure per-row FMA + SiLU + matmul + residual.
    x32 = z_f.astype(jnp.float32)
    mean = jnp.mean(x32, axis=0, keepdims=True)
    var = jnp.mean(jnp.square(x32 - mean), axis=0, keepdims=True)
    scale = gamma2 * jax.lax.rsqrt(var + BN_EPS)
    shift = beta2 - mean * scale

    # nf tiling keeps the (double-buffered) resident weight block bounded.
    wdb = 2 * ni * wb                                      # bytes / W^T column, both bufs
    w_cap = min(max_weight_block_bytes, usable // 3)
    if nf * wdb <= w_cap:
        tile_f = nf                                        # whole W^T resident (common)
    else:
        tile_f = max(128, (w_cap // wdb) // 128 * 128)     # lane-aligned column tile
        if tile_f >= nf:
            tile_f = nf
    tiles_f = _cdiv(nf, tile_f)

    # Row tiling sized against the remaining VMEM (2 pipeline buffers per input
    # plus f32 temporaries), capped at 4096 rows, multiple of 8, and with enough
    # grid steps for the two v7x TensorCores.
    per_row = 2 * (ni * xb + tile_f * (zb + ob)) + 4 * (3 * ni + 3 * tile_f)
    resident = 2 * (ni * tile_f * wb + 4 * (2 * ni + tile_f))
    row_budget = max(8 * per_row, usable - resident)
    tile_n = min(4096, max(8, (row_budget // per_row) // 8 * 8), _round_up(n, 8))
    min_steps = 4 if n >= 64 else 2
    while _cdiv(n, tile_n) * tiles_f < min_steps and tile_n > 8:
        tile_n = max(8, _round_up(tile_n // 2, 8))

    grid = (_cdiv(n, tile_n), tiles_f)          # partial last blocks are masked by Pallas
    vmem_need = tile_n * per_row + resident
    vmem_limit = max(16 << 20, min(int(physical * 0.9), vmem_need + (4 << 20)))

    return pl.pallas_call(
        _point_block_tile_kernel,
        out_shape=jax.ShapeDtypeStruct((n, nf), z1_f.dtype),
        grid=grid,
        in_specs=[
            pl.BlockSpec((tile_n, tile_f), lambda i, j: (i, j)),   # z1 row tile
            pl.BlockSpec((tile_n, ni), lambda i, j: (i, 0)),       # z row tile (held over j)
            pl.BlockSpec((1, ni), lambda i, j: (0, 0)),            # BN scale (resident)
            pl.BlockSpec((1, ni), lambda i, j: (0, 0)),            # BN shift (resident)
            pl.BlockSpec((ni, tile_f), lambda i, j: (0, j)),       # W^T column tile
            pl.BlockSpec((1, tile_f), lambda i, j: (0, j)),        # bias tile
        ],
        out_specs=pl.BlockSpec((tile_n, tile_f), lambda i, j: (i, j)),
        compiler_params=pltpu.CompilerParams(
            dimension_semantics=("parallel", "parallel"),
            vmem_limit_bytes=vmem_limit,
        ),
        cost_estimate=cost,
    )(z1_f, z_f, scale, shift, w_t, bias2)


# -----------------------------------------------------------------------------
# Reference & self-test
# -----------------------------------------------------------------------------
def point_block_ref(z1_f, z_f, gamma, beta, weight, bias):
    """Pure-JAX reference mirroring PyTorch's forward."""
    x = z_f.astype(jnp.float32)
    mean = jnp.mean(x, axis=0, keepdims=True)
    var = jnp.mean((x - mean) ** 2, axis=0, keepdims=True)
    xn = (x - mean) / jnp.sqrt(var + BN_EPS) * gamma + beta
    s = xn * jax.nn.sigmoid(xn)
    y = jnp.dot(s, weight.T, precision=jax.lax.Precision.HIGHEST) + bias
    return z1_f.astype(jnp.float32) + y


def _make_inputs(key, n, ni, nf):
    k1, k2, k3, k4, k5, k6 = jax.random.split(key, 6)
    z1_f = jax.random.normal(k1, (n, nf), dtype=jnp.float32)
    z_f = jax.random.normal(k2, (n, ni), dtype=jnp.float32)
    gamma = 1.0 + 0.1 * jax.random.normal(k5, (ni,), dtype=jnp.float32)
    beta = 0.1 * jax.random.normal(k6, (ni,), dtype=jnp.float32)
    bound = 1.0 / (ni ** 0.5)
    weight = jax.random.uniform(k3, (nf, ni), minval=-bound, maxval=bound,
                                dtype=jnp.float32)
    bias = jax.random.uniform(k4, (nf,), minval=-bound, maxval=bound,
                              dtype=jnp.float32)
    return z1_f, z_f, gamma, beta, weight, bias


if __name__ == "__main__":
    key = jax.random.PRNGKey(0)
    k_a, k_b, k_c = jax.random.split(key, 3)

    # A) tiny cloud -> fused grid-less kernel (BN stats computed in-kernel).
    args_a = _make_inputs(k_a, 8, 16, 32)
    out_a = jax.block_until_ready(point_block(*args_a))
    ref_a = point_block_ref(*args_a)
    assert out_a.shape == ref_a.shape
    assert jnp.allclose(out_a, ref_a, atol=1e-3, rtol=1e-3), "fused path mismatch"

    # B) tiled kernel, N not a multiple of the tile (partial last block masked).
    args_b = _make_inputs(k_b, 203, 16, 32)
    out_b = jax.block_until_ready(point_block(*args_b, allow_fused=False))
    ref_b = point_block_ref(*args_b)
    assert out_b.shape == ref_b.shape
    assert jnp.allclose(out_b, ref_b, atol=1e-3, rtol=1e-3), "tiled path mismatch"

    # C) tiled kernel with the nf (weight-column) grid axis forced on.
    args_c = _make_inputs(k_c, 64, 128, 256)
    out_c = jax.block_until_ready(
        point_block(*args_c, allow_fused=False,
                    max_weight_block_bytes=128 * 1024))
    ref_c = point_block_ref(*args_c)
    assert out_c.shape == ref_c.shape
    assert jnp.allclose(out_c, ref_c, atol=1e-3, rtol=1e-3), "nf-tiled path mismatch"

    print("KERNEL_OK")
</pallas_src>

<mosaic_0001>
module attributes {stable_mosaic.version = 11 : i64} {
  func.func @_point_block_fused_kernel(%arg0: memref<8x32xf32, #tpu.memory_space<vmem>>, %arg1: memref<8x16xf32, #tpu.memory_space<vmem>>, %arg2: memref<1x16xf32, #tpu.memory_space<vmem>>, %arg3: memref<1x16xf32, #tpu.memory_space<vmem>>, %arg4: memref<16x32xf32, #tpu.memory_space<vmem>>, %arg5: memref<1x32xf32, #tpu.memory_space<vmem>>, %arg6: memref<8x32xf32, #tpu.memory_space<vmem>>) attributes {dimension_semantics = [], scalar_prefetch = 0 : i64, scratch_operands = 0 : i64, tpu.core_type = #tpu.core_type<tc>} {
    %c0 = arith.constant 0 : index
    %c0_0 = arith.constant 0 : index
    %0 = vector.load %arg1[%c0, %c0_0] : memref<8x16xf32, #tpu.memory_space<vmem>>, vector<8x16xf32>
    %cst = arith.constant dense<0.000000e+00> : vector<16xf32>
    %1 = vector.multi_reduction <add>, %0, %cst [0] : vector<8x16xf32> to vector<16xf32>
    %2 = vector.shape_cast %1 : vector<16xf32> to vector<1x16xf32>
    %cst_1 = arith.constant 8.000000e+00 : f32
    %3 = vector.broadcast %cst_1 : f32 to vector<1x16xf32>
    %4 = arith.divf %2, %3 : vector<1x16xf32>
    %5 = vector.broadcast %4 : vector<1x16xf32> to vector<8x16xf32>
    %6 = arith.subf %0, %5 : vector<8x16xf32>
    %7 = arith.mulf %6, %6 : vector<8x16xf32>
    %cst_2 = arith.constant dense<0.000000e+00> : vector<16xf32>
    %8 = vector.multi_reduction <add>, %7, %cst_2 [0] : vector<8x16xf32> to vector<16xf32>
    %9 = vector.shape_cast %8 : vector<16xf32> to vector<1x16xf32>
    %cst_3 = arith.constant 8.000000e+00 : f32
    %10 = vector.broadcast %cst_3 : f32 to vector<1x16xf32>
    %11 = arith.divf %9, %10 : vector<1x16xf32>
    %c0_4 = arith.constant 0 : index
    %c0_5 = arith.constant 0 : index
    %12 = vector.load %arg2[%c0_4, %c0_5] : memref<1x16xf32, #tpu.memory_space<vmem>>, vector<1x16xf32>
    %cst_6 = arith.constant 9.99999974E-6 : f32
    %13 = vector.broadcast %cst_6 : f32 to vector<1x16xf32>
    %14 = arith.addf %11, %13 : vector<1x16xf32>
    %15 = math.rsqrt %14 : vector<1x16xf32>
    %16 = arith.mulf %12, %15 : vector<1x16xf32>
    %c0_7 = arith.constant 0 : index
    %c0_8 = arith.constant 0 : index
    %17 = vector.load %arg3[%c0_7, %c0_8] : memref<1x16xf32, #tpu.memory_space<vmem>>, vector<1x16xf32>
    %18 = arith.mulf %4, %16 : vector<1x16xf32>
    %19 = arith.subf %17, %18 : vector<1x16xf32>
    %20 = vector.broadcast %16 : vector<1x16xf32> to vector<8x16xf32>
    %21 = arith.mulf %0, %20 : vector<8x16xf32>
    %22 = vector.broadcast %19 : vector<1x16xf32> to vector<8x16xf32>
    %23 = arith.addf %21, %22 : vector<8x16xf32>
    %24 = arith.negf %23 : vector<8x16xf32>
    %25 = math.exp %24 : vector<8x16xf32>
    %cst_9 = arith.constant 1.000000e+00 : f32
    %26 = vector.broadcast %cst_9 : f32 to vector<8x16xf32>
    %27 = arith.addf %26, %25 : vector<8x16xf32>
    %28 = arith.divf %26, %27 : vector<8x16xf32>
    %29 = arith.mulf %23, %28 : vector<8x16xf32>
    %c0_10 = arith.constant 0 : index
    %c0_11 = arith.constant 0 : index
    %30 = vector.load %arg4[%c0_10, %c0_11] : memref<16x32xf32, #tpu.memory_space<vmem>>, vector<16x32xf32>
    %cst_12 = arith.constant dense<0.000000e+00> : vector<8x32xf32>
    %31 = tpu.matmul %29, %30, %cst_12 {dimension_numbers = #tpu.dot_dimension_numbers<[1], [0], [0], [1], [0, 0, 1, 1], [], []>} : vector<8x16xf32>, vector<16x32xf32>, vector<8x32xf32> -> vector<8x32xf32>
    %c0_13 = arith.constant 0 : index
    %c0_14 = arith.constant 0 : index
    %32 = vector.load %arg5[%c0_13, %c0_14] : memref<1x32xf32, #tpu.memory_space<vmem>>, vector<1x32xf32>
    %33 = vector.broadcast %32 : vector<1x32xf32> to vector<8x32xf32>
    %34 = arith.addf %31, %33 : vector<8x32xf32>
    %c0_15 = arith.constant 0 : index
    %c0_16 = arith.constant 0 : index
    %35 = vector.load %arg0[%c0_15, %c0_16] : memref<8x32xf32, #tpu.memory_space<vmem>>, vector<8x32xf32>
    %36 = arith.addf %35, %34 : vector<8x32xf32>
    %c0_17 = arith.constant 0 : index
    %c0_18 = arith.constant 0 : index
    %37 = vector.load %arg6[%c0_17, %c0_18] : memref<8x32xf32, #tpu.memory_space<vmem>>, vector<8x32xf32>
    tpu.vector_store %arg6[%c0_17, %c0_18], %36 {strides = array<i32>} : memref<8x32xf32, #tpu.memory_space<vmem>>, vector<8x32xf32>,
    return
  }
}

</mosaic_0001>

<bundles_post_ra>
// kernel: point_block.1
= control target key start
LH: loop header
LB: loop body
LE: loop exit
PB: predicated region body
PF: predicated region fallthrough
CT: control target
= control target key end

     0   :  { %11 = vsyncpa [#allocation3], 0  ;;  %s346_s0 = inlined_call_operand.vmem [shape: f32[8,32], index: 0, kind: input, shape index: {}]   ;;  %s347_s1 = inlined_call_operand.hbm [shape: f32[8,16], index: 1, kind: input, shape index: {}]   ;;  %s348_s2 = inlined_call_operand.vmem [shape: f32[1,16], index: 2, kind: input, shape index: {}]   ;;  %s349_s3 = inlined_call_operand.vmem [shape: f32[1,16], index: 3, kind: input, shape index: {}]   ;;  %s350_s4 = inlined_call_operand.vmem [shape: f32[16,32], index: 4, kind: input, shape index: {}]   ;;  %s351_s5 = inlined_call_operand.vmem [shape: f32[1,32], index: 5, kind: input, shape index: {}]   ;;  %s352_s6 = inlined_call_operand.hbm [shape: f32[8,32], index: 6, kind: output, shape index: {}]  }
   0x1   :  { %12 = vsyncpa [#allocation4], 0  ;;  %s261_s21 = smov [#allocation2]   ;;  %s213_s25 = scalar_lea.hbm %s347_s1, 128 }
   0x2   :  { %s21_s22 = sshll.u32 %s261_s21, 4  ;;  %p214_p0 = scmp.ne.s32.totalorder %s347_s1, %s213_s25  ;;  %s22_s22 = int_to_ptr.vmem [resolvable:$true] %s21_s22 }
   0x3   :  { %p217_p1 = scmp.lt.u32.totalorder %s213_s25, %s347_s1 }
   0x5   :  { %p219_p2 = pnand %p217_p1, %p214_p0 }
   0x7   :  { %222 = shalt.err (!%p219_p2)
}
   0x8   :  { %s223_s30 = scalar_lea.vmem %s22_s22, 128  ;;  %p228_p4 = scmp.lt.s32.totalorder %s22_s22, %s22_s22 }
   0x9   :  { %p224_p3 = scmp.ne.s32.totalorder %s22_s22, %s223_s30  ;;  %p229_p5 = scmp.lt.s32.totalorder %s223_s30, %s223_s30 }
   0xb   :  { %p230_p6 = por %p229_p5, %p228_p4 }
   0xd   :  { %p231_p7 = pnand %p230_p6, %p224_p3 }
   0xf   :  { %234 = shalt.err (!%p231_p7)
}
  0x10   :  { %24 = dma.hbm_to_vmem [thread:$0]  %s347_s1, 128, %s22_s22, [#allocation3]  }
  0x11   :  { %257 = dma.done.wait [#allocation3], 128  }
  0x12   :  { %258 = vsyncadd [#allocation3], 4294967168  ;;  %v262_v0 = vmov 0.0|0.0   ;;  %vm263_vm0 = vmmov 0   ;;  %v264_v1 = vmov 0.0   ;;  %vm37_vm1 = vcmask 130048  }
  0x13   :  { %199 = vmatprep.subr.bf16.mxu0 %v262_v0  ;;  %196 = vmatprep.mubr.msk.f32.mxu0 %vm263_vm0, %v264_v1  ;;  %v85_v2 = vld [vmem:[%s350_s4] sm:$0xff]  ;;  %v86_v3 = vld [vmem:[%s350_s4 + $0x8] sm:$0xff]  ;;  %v65_v25 = vlaneseq  ;;  %s265_s17 = smov [#allocation5]   ;;  %vm169_vm2 = vcmask 261120  }
  0x14   :  { %v36_v4 = vld [vmem:[#allocation2] sm:$0xff]  ;;  %v200_v5 = vpack.c.bf16 %v86_v3, %v85_v2  ;;  %s177_s18 = sshll.u32 %s265_s17, 4  ;;  %s178_s18 = int_to_ptr.vmem [resolvable:$true] %s177_s18 }
  0x15   :  { %v38_v6 = vsel %vm37_vm1, %v36_v4, 0.0  ;;  %v66_v26 = vshrl.u32 %v65_v25, 7  ;;  %v57_v27 = vld [vmem:[%s348_s2] sm:$0x1]  ;;  %s235_s19 = scalar_lea.vmem %s178_s18, 128  ;;  %p240_p9 = scmp.lt.s32.totalorder %s178_s18, %s178_s18 }
  0x16   :  { %v39_v7 = vrot.slane %v38_v6, 4  ;;  %201 = vmatpush3.bf16.msra.mxu0 %v200_v5  ;;  %v61_v31 = vld [vmem:[%s349_s3] sm:$0x1]  ;;  %p236_p8 = scmp.ne.s32.totalorder %s178_s18, %s235_s19  ;;  %p241_p10 = scmp.lt.s32.totalorder %s235_s19, %s235_s19 }
  0x17   :  { %v67_v28 = vsub.s32 0, %v66_v26  ;;  %v187_v43 = vld [vmem:[%s351_s5] ss:$0 sm:$0xff] }
  0x18   :  { %v40_v8 = vadd.f32 %v39_v7, %v38_v6  ;;  %v167_v45 = vld [vmem:[%s346_s0] sm:$0xff]  ;;  %p242_p11 = por %p241_p10, %p240_p9 }
  0x1a   :  { %v41_v9 = vrot.slane %v40_v8, 2  ;;  %p243_p12 = pnand %p242_p11, %p236_p8 }
  0x1c   :  { %v42_v10 = vadd.f32 %v41_v9, %v40_v8 }
  0x1e   :  { %v43_v11 = vrot.slane %v42_v10, 1 }
  0x20   :  { %v44_v12 = vadd.f32 %v43_v11, %v42_v10 }
  0x22   :  { %v46_v13 = vmul.f32 0.125, %v44_v12 }
  0x24   :  { %v47_v14 = vsub.f32 %v36_v4, %v46_v13 }
  0x26   :  { %v48_v15 = vmul.f32 %v47_v14, %v47_v14 }
  0x28   :  { %v49_v16 = vsel %vm37_vm1, %v48_v15, 0.0 }
  0x29   :  { %v50_v17 = vrot.slane %v49_v16, 4 }
  0x2b   :  { %v51_v18 = vadd.f32 %v50_v17, %v49_v16 }
  0x2d   :  { %v52_v19 = vrot.slane %v51_v18, 2 }
  0x2f   :  { %v53_v20 = vadd.f32 %v52_v19, %v51_v18 }
  0x31   :  { %v54_v21 = vrot.slane %v53_v20, 1 }
  0x33   :  { %v55_v22 = vadd.f32 %v54_v21, %v53_v20 }
  0x35   :  { %v56_v23 = vmul.f32 0.125, %v55_v22 }
  0x37   :  { %v58_v24 = vadd.f32 1e-05, %v56_v23 }
  0x39   :  { %207 = vrsqrt.f32 %v58_v24 }
  0x43   :  { %v208_v29 = vpop.eup %207 }
  0x44   :  { %v60_v30 = vmul.f32 %v208_v29, %v57_v27 }
  0x46   :  { %v62_v32 = vmul.f32 %v60_v30, %v46_v13  ;;  %v68_v33 = vrot.slane %v60_v30, %v67_v28 }
  0x48   :  { %v63_v34 = vsub.f32 %v61_v31, %v62_v32  ;;  %v70_v35 = vmul.f32 %v68_v33, %v36_v4 }
  0x4a   :  { %v75_v36 = vrot.slane %v63_v34, %v67_v28 }
  0x4c   :  { %v77_v37 = vadd.f32 %v75_v36, %v70_v35 }
  0x4e   :  { %v186_v38 = vmul.f32 -1.442695, %v77_v37 }
  0x50   :  { %209 = vpow2.f32 %v186_v38 }
  0x5a   :  { %v210_v39 = vpop.eup %209 }
  0x5b   :  { %v81_v40 = vadd.f32 1.0, %v210_v39 }
  0x5d   :  { %211 = vrcp.f32 %v81_v40 }
  0x67   :  { %v212_v41 = vpop.eup %211 }
  0x68   :  { %v84_v42 = vmul.f32 %v212_v41, %v77_v37 }
  0x6a   :  { %197 = vmatmul.mubr.msk.f32.vlgmr.msra.gmra.mrb[0].mxu0 %vm37_vm1, %v84_v42 }
 0x13d   :  { %v163_v44 = vpop.f32.mrb[0].mxu0 }
 0x13e   :  { %v164_v46 = vadd.f32 %v187_v43, %v163_v44  ;;  %v198_v47 = vpop.f32.mrb[1].mxu0 }
 0x140   :  { %v168_v48 = vadd.f32 %v167_v45, %v164_v46 }
 0x142   :  { %170 = vst.msk [vmem:[#allocation5] sm:$0xff] %vm169_vm2, %v168_v48 }
 0x143   :  { %246 = shalt.err (!%p243_p12)
}
 0x144   :  { %s247_s21 = scalar_lea.hbm %s352_s6, 128 }
 0x145   :  { %p248_p13 = scmp.ne.s32.totalorder %s352_s6, %s247_s21  ;;  %p251_p0 = scmp.lt.u32.totalorder %s247_s21, %s352_s6 }
 0x147   :  { %p253_p1 = pnand %p251_p0, %p248_p13 }
 0x149   :  { %256 = shalt.err (!%p253_p1)
}
 0x14a   :  { %180 = dma.vmem_to_hbm [thread:$0]  %s178_s18, 128, %s352_s6, [#allocation4]  }
 0x14b   :  { %259 = dma.done.wait [#allocation4], 128  }
 0x14c   :  { %260 = vsyncadd [#allocation4], 4294967168 }
 0x14d   :  { %184 = vsyncpa [#allocation3], 1 }
 0x14e   :  { %185 = vsyncpa [#allocation4], 1 }

</bundles_post_ra>
